<compile_context>
chip_gen: v5e
topology: v5e:2x2
jax: 0.10.0
libtpu: 0.0.40
codegen_flags: <defaults>
</compile_context>

<pallas_src>
import jax
import jax.numpy as jnp
from jax.experimental import pallas as pl
from jax.experimental.pallas import tpu as pltpu

# nn.CrossEntropyLoss(weight=[0.33, 1.0], reduction='none')
CLASS_W0 = 0.33
CLASS_W1 = 1.0

_LANE = 128
_MAX_LANE_TILE = 512   # >=512-lane tiles reach ~85% of HBM roofline.


# --------------------------- kernel helpers ---------------------------------
def _unpack(packed):
    """Decode the int8 bitfield (bit0=label, bit1=zero, bit2=acc)."""
    p = packed.astype(jnp.int32)
    label1 = (p & 1) == 1
    zero_m = (p & 2) != 0
    acc_m = (p & 4) != 0
    return label1, zero_m, acc_m


def _ce_stats(l0, l1, label1, zero_m, acc_m):
    """Weighted 2-class CE + masking + per-batch-row reductions for one tile."""
    # Single-transcendental stable 2-class log-sum-exp.
    m = jnp.maximum(l0, l1)
    lse = m + jnp.log(1.0 + jnp.exp(-jnp.abs(l1 - l0)))
    # loss = -w_y * log p_y, class weight folded into the select.
    loss = jnp.where(label1, CLASS_W1 * (lse - l1), CLASS_W0 * (lse - l0))
    # losses[mask] = 0 ; then keep only strictly-positive losses (matches ref).
    keep = jnp.logical_and(jnp.logical_not(zero_m), loss > 0.0)
    loss = jnp.where(keep, loss, 0.0)

    # argmax over the class dim (tie -> class 0, matching jnp/torch argmax).
    pred1 = l1 > l0
    correct = jnp.logical_and(pred1 == label1, acc_m).astype(jnp.float32)

    return (jnp.sum(loss, axis=-1, keepdims=True),
            jnp.sum(correct, axis=-1, keepdims=True),
            jnp.sum(acc_m.astype(jnp.float32), axis=-1, keepdims=True))


def _split_classes(logits_ref):
    x = logits_ref[...].astype(jnp.float32)      # (B, 2, Lt), upcast in-kernel
    return x[:, 0, :], x[:, 1, :]                # (B, Lt) each


# ------------------------------- kernels -------------------------------------
def _edge_s1_kernel(logits_ref, packed_ref, loss_ref, corr_ref, val_ref):
    label1, zero_m, acc_m = _unpack(packed_ref[...])
    l0, l1 = _split_classes(logits_ref)
    loss, corr, val = _ce_stats(l0, l1, label1, zero_m, acc_m)
    loss_ref[0] = loss
    corr_ref[0] = corr
    val_ref[0] = val


def _edge_s2_kernel(logits_h_ref, logits_r_ref, packed_ref,
                    loss_h_ref, corr_h_ref, val_h_ref,
                    loss_r_ref, corr_r_ref, val_r_ref):
    # Shared masks/labels are DMA'd and decoded once for both heads.
    label1, zero_m, acc_m = _unpack(packed_ref[...])

    l0, l1 = _split_classes(logits_h_ref)
    loss, corr, val = _ce_stats(l0, l1, label1, zero_m, acc_m)
    loss_h_ref[0] = loss
    corr_h_ref[0] = corr
    val_h_ref[0] = val

    l0, l1 = _split_classes(logits_r_ref)
    loss, corr, val = _ce_stats(l0, l1, label1, zero_m, acc_m)
    loss_r_ref[0] = loss
    corr_r_ref[0] = corr
    val_r_ref[0] = val


# ------------------------------ wrappers -------------------------------------
def _round_up(x, m):
    return ((x + m - 1) // m) * m


def _lane_tiling(length):
    """Pad the lane axis to a multiple of the tile; tile <= _MAX_LANE_TILE."""
    if length <= _MAX_LANE_TILE:
        lpad = _round_up(max(length, 1), _LANE)
        return lpad, lpad
    lpad = _round_up(length, _MAX_LANE_TILE)
    return lpad, _MAX_LANE_TILE


def _pad_lane(x, lpad, value=0):
    l = x.shape[-1]
    if l == lpad:
        return x
    pad = [(0, 0)] * (x.ndim - 1) + [(0, lpad - l)]
    return jnp.pad(x, pad, constant_values=value)


def _pack_masks(labels, zero_mask, acc_mask, lpad):
    """Bit-pack labels / zero / acc into one int8 plane (1 B per position)."""
    packed = (labels.astype(jnp.int32)
              + 2 * zero_mask.astype(jnp.int32)
              + 4 * acc_mask.astype(jnp.int32)).astype(jnp.int8)
    # Padding positions: label 0, zero_mask 1, acc_mask 0 -> bitfield value 2.
    return _pad_lane(packed, lpad, value=2)


def _run_stage1(logits, packed, lane_tile):
    B = logits.shape[0]
    n_l = logits.shape[-1] // lane_tile
    part = jax.ShapeDtypeStruct((n_l, B, 1), jnp.float32)
    out_spec = pl.BlockSpec((1, B, 1), lambda l: (l, 0, 0))
    return pl.pallas_call(
        _edge_s1_kernel,
        out_shape=(part, part, part),
        grid_spec=pltpu.PrefetchScalarGridSpec(
            num_scalar_prefetch=0,
            grid=(n_l,),
            in_specs=[pl.BlockSpec((B, 2, lane_tile), lambda l: (0, 0, l)),
                      pl.BlockSpec((B, lane_tile), lambda l: (0, l))],
            out_specs=(out_spec, out_spec, out_spec)),
        compiler_params=pltpu.CompilerParams(
            dimension_semantics=("parallel",)),
    )(logits, packed)


def _run_stage2(logits_h, logits_r, packed, lane_tile):
    B = logits_h.shape[0]
    n_l = logits_h.shape[-1] // lane_tile
    part = jax.ShapeDtypeStruct((n_l, B, 1), jnp.float32)
    out_spec = pl.BlockSpec((1, B, 1), lambda l: (l, 0, 0))
    logit_spec = pl.BlockSpec((B, 2, lane_tile), lambda l: (0, 0, l))
    return pl.pallas_call(
        _edge_s2_kernel,
        out_shape=(part,) * 6,
        grid_spec=pltpu.PrefetchScalarGridSpec(
            num_scalar_prefetch=0,
            grid=(n_l,),
            in_specs=[logit_spec, logit_spec,
                      pl.BlockSpec((B, lane_tile), lambda l: (0, l))],
            out_specs=(out_spec,) * 6),
        compiler_params=pltpu.CompilerParams(
            dimension_semantics=("parallel",)),
    )(logits_h, logits_r, packed)


def _finalize(loss_part, corr_part, val_part, batch):
    """Tiny cross-tile / cross-batch epilogue (stays in plain JAX)."""
    loss = jnp.sum(loss_part) / batch
    correct_b = jnp.sum(corr_part, axis=(0, 2))
    valid_b = jnp.sum(val_part, axis=(0, 2))
    has = valid_b > 0
    per_b = correct_b / jnp.maximum(valid_b, 1.0)
    n = jnp.sum(has.astype(jnp.float32))
    acc = jnp.where(
        n > 0,
        jnp.sum(jnp.where(has, per_b, 0.0)) / jnp.maximum(n, 1.0),
        0.0)
    return loss, acc


@jax.jit
def edge_criterion_forward(logits_s1, logits_s2_hybrid, logits_s2_rel,
                           s2_ids, s2_edge_mask, edge_labels, edge_lengths,
                           edge_mask, s2_gt_values):
    B, C, L = logits_s1.shape
    assert C == 2
    L2 = s2_ids.shape[1]
    lpad1, lt1 = _lane_tiling(L)
    lpad2, lt2 = _lane_tiling(L2)

    # --- stage 1 ---
    pos_l = jnp.arange(L)[None, :]
    # gt_values == 2 everywhere for s1 -> acc mask is just pos < edge_lengths.
    s1_acc_mask = pos_l < edge_lengths[:, None]
    s1_packed = _pack_masks(edge_labels, edge_mask, s1_acc_mask, lpad1)
    loss1_p, corr1_p, val1_p = _run_stage1(
        _pad_lane(logits_s1, lpad1), s1_packed, lt1)
    s1_loss, s1_acc = _finalize(loss1_p, corr1_p, val1_p, B)

    # --- stage 2 (hybrid + rel fused into one kernel) ---
    s2_labels = jnp.take_along_axis(edge_labels, s2_ids, axis=1)
    s2_zero = jnp.logical_or(s2_edge_mask.astype(bool), s2_gt_values != 2)
    s2_edge_lengths = jnp.sum((s2_edge_mask == 0).astype(jnp.int32), axis=-1)
    pos_l2 = jnp.arange(L2)[None, :]
    s2_acc_mask = jnp.logical_and(pos_l2 < s2_edge_lengths[:, None],
                                  s2_gt_values == 2)
    s2_packed = _pack_masks(s2_labels, s2_zero, s2_acc_mask, lpad2)

    (loss_h_p, corr_h_p, val_h_p,
     loss_r_p, corr_r_p, val_r_p) = _run_stage2(
        _pad_lane(logits_s2_hybrid, lpad2),
        _pad_lane(logits_s2_rel, lpad2),
        s2_packed, lt2)
    s2_loss_h, s2_acc_h = _finalize(loss_h_p, corr_h_p, val_h_p, B)
    s2_loss_r, s2_acc_r = _finalize(loss_r_p, corr_r_p, val_r_p, B)

    return (s1_loss, s1_acc, s2_loss_h, s2_acc_h, s2_loss_r, s2_acc_r)


# ------------------------- pure-JAX reference --------------------------------
def _ref_stage(logits_bcl, labels, zero_mask, acc_mask):
    B = logits_bcl.shape[0]
    logp = jax.nn.log_softmax(logits_bcl.astype(jnp.float32), axis=1)
    logp_y = jnp.take_along_axis(logp, labels[:, None, :], axis=1)[:, 0, :]
    w = jnp.where(labels == 1, CLASS_W1, CLASS_W0).astype(jnp.float32)
    loss = -w * logp_y
    loss = jnp.where(zero_mask == 1, 0.0, loss)
    loss = jnp.where(loss > 0.0, loss, 0.0)
    loss_scalar = jnp.sum(loss) / B

    pred = jnp.argmax(logits_bcl, axis=1)
    correct = ((pred == labels) & (acc_mask == 1)).astype(jnp.float32)
    correct_b = jnp.sum(correct, axis=1)
    valid_b = jnp.sum(acc_mask.astype(jnp.float32), axis=1)
    has_valid = valid_b > 0
    per_b = correct_b / jnp.maximum(valid_b, 1.0)
    n = jnp.sum(has_valid.astype(jnp.float32))
    acc = jnp.where(n > 0,
                    jnp.sum(jnp.where(has_valid, per_b, 0.0))
                    / jnp.maximum(n, 1.0),
                    0.0)
    return loss_scalar, acc


def _ref_forward(logits_s1, logits_s2_hybrid, logits_s2_rel, s2_ids,
                 s2_edge_mask, edge_labels, edge_lengths, edge_mask,
                 s2_gt_values):
    L = edge_labels.shape[1]
    L2 = s2_ids.shape[1]
    s1_zero = edge_mask.astype(jnp.int32)
    s1_acc_mask = (jnp.arange(L)[None, :] < edge_lengths[:, None]).astype(jnp.int32)
    s1_loss, s1_acc = _ref_stage(logits_s1, edge_labels, s1_zero, s1_acc_mask)

    s2_labels = jnp.take_along_axis(edge_labels, s2_ids, axis=1)
    s2_zero = (s2_edge_mask | (s2_gt_values != 2)).astype(jnp.int32)
    s2_edge_lengths = jnp.sum((s2_edge_mask == 0).astype(jnp.int32), axis=-1)
    s2_acc_mask = ((jnp.arange(L2)[None, :] < s2_edge_lengths[:, None])
                   & (s2_gt_values == 2)).astype(jnp.int32)
    s2_lh, s2_ah = _ref_stage(logits_s2_hybrid, s2_labels, s2_zero, s2_acc_mask)
    s2_lr, s2_ar = _ref_stage(logits_s2_rel, s2_labels, s2_zero, s2_acc_mask)
    return (s1_loss, s1_acc, s2_lh, s2_ah, s2_lr, s2_ar)


if __name__ == "__main__":
    key = jax.random.PRNGKey(0)
    ks = jax.random.split(key, 9)

    B, L, L2 = 2, 16, 8

    logits_s1 = jax.random.normal(ks[0], (B, 2, L), dtype=jnp.float32)
    logits_s2_hybrid = jax.random.normal(ks[1], (B, 2, L2), dtype=jnp.float32)
    logits_s2_rel = jax.random.normal(ks[2], (B, 2, L2), dtype=jnp.float32)
    s2_ids = jax.random.randint(ks[3], (B, L2), 0, L, dtype=jnp.int32)
    s2_edge_mask = jax.random.bernoulli(ks[4], 0.3, (B, L2))
    edge_labels = jax.random.randint(ks[5], (B, L), 0, 2, dtype=jnp.int32)
    edge_lengths = jax.random.randint(ks[6], (B,), 4, L + 1, dtype=jnp.int32)
    edge_mask = jax.random.bernoulli(ks[7], 0.3, (B, L))
    s2_gt_values = jax.random.randint(ks[8], (B, L2), 0, 3, dtype=jnp.int32)

    outs = edge_criterion_forward(
        logits_s1, logits_s2_hybrid, logits_s2_rel, s2_ids, s2_edge_mask,
        edge_labels, edge_lengths, edge_mask, s2_gt_values)
    outs = jax.block_until_ready(outs)

    refs = _ref_forward(
        logits_s1, logits_s2_hybrid, logits_s2_rel, s2_ids, s2_edge_mask,
        edge_labels, edge_lengths, edge_mask, s2_gt_values)
    refs = jax.block_until_ready(refs)

    for o, r in zip(outs, refs):
        assert jnp.allclose(o, r, atol=1e-5, rtol=1e-5), (o, r)

    print("KERNEL_OK")
</pallas_src>

<mosaic_0001>
module attributes {stable_mosaic.version = 11 : i64} {
  func.func @_edge_s1_kernel(%arg0: i32, %arg1: memref<2x2x128xf32, #tpu.memory_space<vmem>>, %arg2: memref<2x128xi8, #tpu.memory_space<vmem>>, %arg3: memref<1x2x1xf32, #tpu.memory_space<vmem>>, %arg4: memref<1x2x1xf32, #tpu.memory_space<vmem>>, %arg5: memref<1x2x1xf32, #tpu.memory_space<vmem>>) attributes {dimension_semantics = [#tpu.dimension_semantics<parallel>], iteration_bounds = array<i64: 1>, scalar_prefetch = 0 : i64, scratch_operands = 0 : i64, tpu.core_type = #tpu.core_type<tc>, window_params = [{transform_indices = @transform_0, window_bounds = array<i64: 2, 2, 128>}, {transform_indices = @transform_1, window_bounds = array<i64: 2, 128>}, {transform_indices = @transform_2, window_bounds = array<i64: 1, 2, 1>}, {transform_indices = @transform_3, window_bounds = array<i64: 1, 2, 1>}, {transform_indices = @transform_4, window_bounds = array<i64: 1, 2, 1>}]} {
    %c0 = arith.constant 0 : index
    %c0_0 = arith.constant 0 : index
    %0 = vector.load %arg2[%c0, %c0_0] : memref<2x128xi8, #tpu.memory_space<vmem>>, vector<2x128xi8>
    %1 = arith.extsi %0 : vector<2x128xi8> to vector<2x128xi32>
    %c1_i32 = arith.constant 1 : i32
    %2 = vector.broadcast %c1_i32 : i32 to vector<2x128xi32>
    %3 = arith.andi %1, %2 : vector<2x128xi32>
    %c1_i32_1 = arith.constant 1 : i32
    %4 = vector.broadcast %c1_i32_1 : i32 to vector<2x128xi32>
    %5 = arith.cmpi eq, %3, %4 : vector<2x128xi32>
    %c2_i32 = arith.constant 2 : i32
    %6 = vector.broadcast %c2_i32 : i32 to vector<2x128xi32>
    %7 = arith.andi %1, %6 : vector<2x128xi32>
    %c0_i32 = arith.constant 0 : i32
    %8 = vector.broadcast %c0_i32 : i32 to vector<2x128xi32>
    %9 = arith.cmpi ne, %7, %8 : vector<2x128xi32>
    %c4_i32 = arith.constant 4 : i32
    %10 = vector.broadcast %c4_i32 : i32 to vector<2x128xi32>
    %11 = arith.andi %1, %10 : vector<2x128xi32>
    %c0_i32_2 = arith.constant 0 : i32
    %12 = vector.broadcast %c0_i32_2 : i32 to vector<2x128xi32>
    %13 = arith.cmpi ne, %11, %12 : vector<2x128xi32>
    %c0_3 = arith.constant 0 : index
    %c0_4 = arith.constant 0 : index
    %c0_5 = arith.constant 0 : index
    %14 = vector.load %arg1[%c0_3, %c0_4, %c0_5] : memref<2x2x128xf32, #tpu.memory_space<vmem>>, vector<2x2x128xf32>
    %15 = vector.extract_strided_slice %14 {offsets = [0, 0, 0], sizes = [2, 1, 128], strides = [1, 1, 1]} : vector<2x2x128xf32> to vector<2x1x128xf32>
    %16 = vector.shape_cast %15 : vector<2x1x128xf32> to vector<2x128xf32>
    %17 = vector.extract_strided_slice %14 {offsets = [0, 1, 0], sizes = [2, 1, 128], strides = [1, 1, 1]} : vector<2x2x128xf32> to vector<2x1x128xf32>
    %18 = vector.shape_cast %17 : vector<2x1x128xf32> to vector<2x128xf32>
    %19 = arith.maximumf %16, %18 : vector<2x128xf32>
    %20 = arith.subf %18, %16 : vector<2x128xf32>
    %21 = math.absf %20 : vector<2x128xf32>
    %cst = arith.constant 0.000000e+00 : f32
    %22 = vector.broadcast %cst : f32 to vector<2x128xf32>
    %23 = arith.subf %22, %21 : vector<2x128xf32>
    %24 = math.exp %23 : vector<2x128xf32>
    %cst_6 = arith.constant 1.000000e+00 : f32
    %25 = vector.broadcast %cst_6 : f32 to vector<2x128xf32>
    %26 = arith.addf %25, %24 : vector<2x128xf32>
    %27 = math.log %26 : vector<2x128xf32>
    %28 = arith.addf %19, %27 : vector<2x128xf32>
    %29 = arith.subf %28, %18 : vector<2x128xf32>
    %cst_7 = arith.constant 1.000000e+00 : f32
    %30 = vector.broadcast %cst_7 : f32 to vector<2x128xf32>
    %31 = arith.mulf %30, %29 : vector<2x128xf32>
    %32 = arith.subf %28, %16 : vector<2x128xf32>
    %cst_8 = arith.constant 3.300000e-01 : f32
    %33 = vector.broadcast %cst_8 : f32 to vector<2x128xf32>
    %34 = arith.mulf %33, %32 : vector<2x128xf32>
    %35 = arith.select %5, %31, %34 : vector<2x128xi1>, vector<2x128xf32>
    %cst_9 = arith.constant dense<true> : vector<2x128xi1>
    %36 = arith.xori %9, %cst_9 : vector<2x128xi1>
    %cst_10 = arith.constant 0.000000e+00 : f32
    %37 = vector.broadcast %cst_10 : f32 to vector<2x128xf32>
    %38 = arith.cmpf ogt, %35, %37 : vector<2x128xf32>
    %39 = arith.andi %36, %38 : vector<2x128xi1>
    %cst_11 = arith.constant 0.000000e+00 : f32
    %40 = vector.broadcast %cst_11 : f32 to vector<2x128xf32>
    %41 = arith.select %39, %35, %40 : vector<2x128xi1>, vector<2x128xf32>
    %42 = arith.cmpf ogt, %18, %16 : vector<2x128xf32>
    %43 = arith.xori %42, %5 : vector<2x128xi1>
    %cst_12 = arith.constant dense<true> : vector<2x128xi1>
    %44 = arith.xori %43, %cst_12 : vector<2x128xi1>
    %45 = arith.andi %44, %13 : vector<2x128xi1>
    %46 = arith.extui %45 : vector<2x128xi1> to vector<2x128xi32>
    %47 = arith.sitofp %46 : vector<2x128xi32> to vector<2x128xf32>
    %cst_13 = arith.constant dense<0.000000e+00> : vector<2xf32>
    %48 = vector.multi_reduction <add>, %41, %cst_13 [1] : vector<2x128xf32> to vector<2xf32>
    %49 = vector.shape_cast %48 : vector<2xf32> to vector<2x1xf32>
    %cst_14 = arith.constant dense<0.000000e+00> : vector<2xf32>
    %50 = vector.multi_reduction <add>, %47, %cst_14 [1] : vector<2x128xf32> to vector<2xf32>
    %51 = vector.shape_cast %50 : vector<2xf32> to vector<2x1xf32>
    %52 = arith.extui %13 : vector<2x128xi1> to vector<2x128xi32>
    %53 = arith.sitofp %52 : vector<2x128xi32> to vector<2x128xf32>
    %cst_15 = arith.constant dense<0.000000e+00> : vector<2xf32>
    %54 = vector.multi_reduction <add>, %53, %cst_15 [1] : vector<2x128xf32> to vector<2xf32>
    %55 = vector.shape_cast %54 : vector<2xf32> to vector<2x1xf32>
    %c0_16 = arith.constant 0 : index
    %c0_17 = arith.constant 0 : index
    %c0_18 = arith.constant 0 : index
    %56 = vector.load %arg3[%c0_16, %c0_17, %c0_18] : memref<1x2x1xf32, #tpu.memory_space<vmem>>, vector<1x2x1xf32>
    %57 = vector.shape_cast %56 : vector<1x2x1xf32> to vector<2x1xf32>
    %58 = vector.shape_cast %49 : vector<2x1xf32> to vector<1x2x1xf32>
    tpu.vector_store %arg3[%c0_16, %c0_17, %c0_18], %58 {strides = array<i32>} : memref<1x2x1xf32, #tpu.memory_space<vmem>>, vector<1x2x1xf32>,
    %c0_19 = arith.constant 0 : index
    %c0_20 = arith.constant 0 : index
    %c0_21 = arith.constant 0 : index
    %59 = vector.load %arg4[%c0_19, %c0_20, %c0_21] : memref<1x2x1xf32, #tpu.memory_space<vmem>>, vector<1x2x1xf32>
    %60 = vector.shape_cast %59 : vector<1x2x1xf32> to vector<2x1xf32>
    %61 = vector.shape_cast %51 : vector<2x1xf32> to vector<1x2x1xf32>
    tpu.vector_store %arg4[%c0_19, %c0_20, %c0_21], %61 {strides = array<i32>} : memref<1x2x1xf32, #tpu.memory_space<vmem>>, vector<1x2x1xf32>,
    %c0_22 = arith.constant 0 : index
    %c0_23 = arith.constant 0 : index
    %c0_24 = arith.constant 0 : index
    %62 = vector.load %arg5[%c0_22, %c0_23, %c0_24] : memref<1x2x1xf32, #tpu.memory_space<vmem>>, vector<1x2x1xf32>
    %63 = vector.shape_cast %62 : vector<1x2x1xf32> to vector<2x1xf32>
    %64 = vector.shape_cast %55 : vector<2x1xf32> to vector<1x2x1xf32>
    tpu.vector_store %arg5[%c0_22, %c0_23, %c0_24], %64 {strides = array<i32>} : memref<1x2x1xf32, #tpu.memory_space<vmem>>, vector<1x2x1xf32>,
    return
  }
  func.func @transform_0(%arg0: i32) -> (i32, i32, i32) {
    %c0_i32 = arith.constant 0 : i32
    %c0_i32_0 = arith.constant 0 : i32
    %c0_i32_1 = arith.constant 0 : i32
    return %c0_i32, %c0_i32_0, %arg0 : i32, i32, i32
  }
  func.func @transform_1(%arg0: i32) -> (i32, i32) {
    %c0_i32 = arith.constant 0 : i32
    %c0_i32_0 = arith.constant 0 : i32
    return %c0_i32, %arg0 : i32, i32
  }
  func.func @transform_2(%arg0: i32) -> (i32, i32, i32) {
    %c0_i32 = arith.constant 0 : i32
    %c0_i32_0 = arith.constant 0 : i32
    %c0_i32_1 = arith.constant 0 : i32
    return %arg0, %c0_i32, %c0_i32_0 : i32, i32, i32
  }
  func.func @transform_3(%arg0: i32) -> (i32, i32, i32) {
    %c0_i32 = arith.constant 0 : i32
    %c0_i32_0 = arith.constant 0 : i32
    %c0_i32_1 = arith.constant 0 : i32
    return %arg0, %c0_i32, %c0_i32_0 : i32, i32, i32
  }
  func.func @transform_4(%arg0: i32) -> (i32, i32, i32) {
    %c0_i32 = arith.constant 0 : i32
    %c0_i32_0 = arith.constant 0 : i32
    %c0_i32_1 = arith.constant 0 : i32
    return %arg0, %c0_i32, %c0_i32_0 : i32, i32, i32
  }
}

module attributes {stable_mosaic.version = 11 : i64} {
  func.func @_edge_s2_kernel(%arg0: i32, %arg1: memref<2x2x128xf32, #tpu.memory_space<vmem>>, %arg2: memref<2x2x128xf32, #tpu.memory_space<vmem>>, %arg3: memref<2x128xi8, #tpu.memory_space<vmem>>, %arg4: memref<1x2x1xf32, #tpu.memory_space<vmem>>, %arg5: memref<1x2x1xf32, #tpu.memory_space<vmem>>, %arg6: memref<1x2x1xf32, #tpu.memory_space<vmem>>, %arg7: memref<1x2x1xf32, #tpu.memory_space<vmem>>, %arg8: memref<1x2x1xf32, #tpu.memory_space<vmem>>, %arg9: memref<1x2x1xf32, #tpu.memory_space<vmem>>) attributes {dimension_semantics = [#tpu.dimension_semantics<parallel>], iteration_bounds = array<i64: 1>, scalar_prefetch = 0 : i64, scratch_operands = 0 : i64, tpu.core_type = #tpu.core_type<tc>, window_params = [{transform_indices = @transform_0, window_bounds = array<i64: 2, 2, 128>}, {transform_indices = @transform_1, window_bounds = array<i64: 2, 2, 128>}, {transform_indices = @transform_2, window_bounds = array<i64: 2, 128>}, {transform_indices = @transform_3, window_bounds = array<i64: 1, 2, 1>}, {transform_indices = @transform_4, window_bounds = array<i64: 1, 2, 1>}, {transform_indices = @transform_5, window_bounds = array<i64: 1, 2, 1>}, {transform_indices = @transform_6, window_bounds = array<i64: 1, 2, 1>}, {transform_indices = @transform_7, window_bounds = array<i64: 1, 2, 1>}, {transform_indices = @transform_8, window_bounds = array<i64: 1, 2, 1>}]} {
    %c0 = arith.constant 0 : index
    %c0_0 = arith.constant 0 : index
    %0 = vector.load %arg3[%c0, %c0_0] : memref<2x128xi8, #tpu.memory_space<vmem>>, vector<2x128xi8>
    %1 = arith.extsi %0 : vector<2x128xi8> to vector<2x128xi32>
    %c1_i32 = arith.constant 1 : i32
    %2 = vector.broadcast %c1_i32 : i32 to vector<2x128xi32>
    %3 = arith.andi %1, %2 : vector<2x128xi32>
    %c1_i32_1 = arith.constant 1 : i32
    %4 = vector.broadcast %c1_i32_1 : i32 to vector<2x128xi32>
    %5 = arith.cmpi eq, %3, %4 : vector<2x128xi32>
    %c2_i32 = arith.constant 2 : i32
    %6 = vector.broadcast %c2_i32 : i32 to vector<2x128xi32>
    %7 = arith.andi %1, %6 : vector<2x128xi32>
    %c0_i32 = arith.constant 0 : i32
    %8 = vector.broadcast %c0_i32 : i32 to vector<2x128xi32>
    %9 = arith.cmpi ne, %7, %8 : vector<2x128xi32>
    %c4_i32 = arith.constant 4 : i32
    %10 = vector.broadcast %c4_i32 : i32 to vector<2x128xi32>
    %11 = arith.andi %1, %10 : vector<2x128xi32>
    %c0_i32_2 = arith.constant 0 : i32
    %12 = vector.broadcast %c0_i32_2 : i32 to vector<2x128xi32>
    %13 = arith.cmpi ne, %11, %12 : vector<2x128xi32>
    %c0_3 = arith.constant 0 : index
    %c0_4 = arith.constant 0 : index
    %c0_5 = arith.constant 0 : index
    %14 = vector.load %arg1[%c0_3, %c0_4, %c0_5] : memref<2x2x128xf32, #tpu.memory_space<vmem>>, vector<2x2x128xf32>
    %15 = vector.extract_strided_slice %14 {offsets = [0, 0, 0], sizes = [2, 1, 128], strides = [1, 1, 1]} : vector<2x2x128xf32> to vector<2x1x128xf32>
    %16 = vector.shape_cast %15 : vector<2x1x128xf32> to vector<2x128xf32>
    %17 = vector.extract_strided_slice %14 {offsets = [0, 1, 0], sizes = [2, 1, 128], strides = [1, 1, 1]} : vector<2x2x128xf32> to vector<2x1x128xf32>
    %18 = vector.shape_cast %17 : vector<2x1x128xf32> to vector<2x128xf32>
    %19 = arith.maximumf %16, %18 : vector<2x128xf32>
    %20 = arith.subf %18, %16 : vector<2x128xf32>
    %21 = math.absf %20 : vector<2x128xf32>
    %cst = arith.constant 0.000000e+00 : f32
    %22 = vector.broadcast %cst : f32 to vector<2x128xf32>
    %23 = arith.subf %22, %21 : vector<2x128xf32>
    %24 = math.exp %23 : vector<2x128xf32>
    %cst_6 = arith.constant 1.000000e+00 : f32
    %25 = vector.broadcast %cst_6 : f32 to vector<2x128xf32>
    %26 = arith.addf %25, %24 : vector<2x128xf32>
    %27 = math.log %26 : vector<2x128xf32>
    %28 = arith.addf %19, %27 : vector<2x128xf32>
    %29 = arith.subf %28, %18 : vector<2x128xf32>
    %cst_7 = arith.constant 1.000000e+00 : f32
    %30 = vector.broadcast %cst_7 : f32 to vector<2x128xf32>
    %31 = arith.mulf %30, %29 : vector<2x128xf32>
    %32 = arith.subf %28, %16 : vector<2x128xf32>
    %cst_8 = arith.constant 3.300000e-01 : f32
    %33 = vector.broadcast %cst_8 : f32 to vector<2x128xf32>
    %34 = arith.mulf %33, %32 : vector<2x128xf32>
    %35 = arith.select %5, %31, %34 : vector<2x128xi1>, vector<2x128xf32>
    %cst_9 = arith.constant dense<true> : vector<2x128xi1>
    %36 = arith.xori %9, %cst_9 : vector<2x128xi1>
    %cst_10 = arith.constant 0.000000e+00 : f32
    %37 = vector.broadcast %cst_10 : f32 to vector<2x128xf32>
    %38 = arith.cmpf ogt, %35, %37 : vector<2x128xf32>
    %39 = arith.andi %36, %38 : vector<2x128xi1>
    %cst_11 = arith.constant 0.000000e+00 : f32
    %40 = vector.broadcast %cst_11 : f32 to vector<2x128xf32>
    %41 = arith.select %39, %35, %40 : vector<2x128xi1>, vector<2x128xf32>
    %42 = arith.cmpf ogt, %18, %16 : vector<2x128xf32>
    %43 = arith.xori %42, %5 : vector<2x128xi1>
    %cst_12 = arith.constant dense<true> : vector<2x128xi1>
    %44 = arith.xori %43, %cst_12 : vector<2x128xi1>
    %45 = arith.andi %44, %13 : vector<2x128xi1>
    %46 = arith.extui %45 : vector<2x128xi1> to vector<2x128xi32>
    %47 = arith.sitofp %46 : vector<2x128xi32> to vector<2x128xf32>
    %cst_13 = arith.constant dense<0.000000e+00> : vector<2xf32>
    %48 = vector.multi_reduction <add>, %41, %cst_13 [1] : vector<2x128xf32> to vector<2xf32>
    %49 = vector.shape_cast %48 : vector<2xf32> to vector<2x1xf32>
    %cst_14 = arith.constant dense<0.000000e+00> : vector<2xf32>
    %50 = vector.multi_reduction <add>, %47, %cst_14 [1] : vector<2x128xf32> to vector<2xf32>
    %51 = vector.shape_cast %50 : vector<2xf32> to vector<2x1xf32>
    %52 = arith.extui %13 : vector<2x128xi1> to vector<2x128xi32>
    %53 = arith.sitofp %52 : vector<2x128xi32> to vector<2x128xf32>
    %cst_15 = arith.constant dense<0.000000e+00> : vector<2xf32>
    %54 = vector.multi_reduction <add>, %53, %cst_15 [1] : vector<2x128xf32> to vector<2xf32>
    %55 = vector.shape_cast %54 : vector<2xf32> to vector<2x1xf32>
    %c0_16 = arith.constant 0 : index
    %c0_17 = arith.constant 0 : index
    %c0_18 = arith.constant 0 : index
    %56 = vector.load %arg4[%c0_16, %c0_17, %c0_18] : memref<1x2x1xf32, #tpu.memory_space<vmem>>, vector<1x2x1xf32>
    %57 = vector.shape_cast %56 : vector<1x2x1xf32> to vector<2x1xf32>
    %58 = vector.shape_cast %49 : vector<2x1xf32> to vector<1x2x1xf32>
    tpu.vector_store %arg4[%c0_16, %c0_17, %c0_18], %58 {strides = array<i32>} : memref<1x2x1xf32, #tpu.memory_space<vmem>>, vector<1x2x1xf32>,
    %c0_19 = arith.constant 0 : index
    %c0_20 = arith.constant 0 : index
    %c0_21 = arith.constant 0 : index
    %59 = vector.load %arg5[%c0_19, %c0_20, %c0_21] : memref<1x2x1xf32, #tpu.memory_space<vmem>>, vector<1x2x1xf32>
    %60 = vector.shape_cast %59 : vector<1x2x1xf32> to vector<2x1xf32>
    %61 = vector.shape_cast %51 : vector<2x1xf32> to vector<1x2x1xf32>
    tpu.vector_store %arg5[%c0_19, %c0_20, %c0_21], %61 {strides = array<i32>} : memref<1x2x1xf32, #tpu.memory_space<vmem>>, vector<1x2x1xf32>,
    %c0_22 = arith.constant 0 : index
    %c0_23 = arith.constant 0 : index
    %c0_24 = arith.constant 0 : index
    %62 = vector.load %arg6[%c0_22, %c0_23, %c0_24] : memref<1x2x1xf32, #tpu.memory_space<vmem>>, vector<1x2x1xf32>
    %63 = vector.shape_cast %62 : vector<1x2x1xf32> to vector<2x1xf32>
    %64 = vector.shape_cast %55 : vector<2x1xf32> to vector<1x2x1xf32>
    tpu.vector_store %arg6[%c0_22, %c0_23, %c0_24], %64 {strides = array<i32>} : memref<1x2x1xf32, #tpu.memory_space<vmem>>, vector<1x2x1xf32>,
    %c0_25 = arith.constant 0 : index
    %c0_26 = arith.constant 0 : index
    %c0_27 = arith.constant 0 : index
    %65 = vector.load %arg2[%c0_25, %c0_26, %c0_27] : memref<2x2x128xf32, #tpu.memory_space<vmem>>, vector<2x2x128xf32>
    %66 = vector.extract_strided_slice %65 {offsets = [0, 0, 0], sizes = [2, 1, 128], strides = [1, 1, 1]} : vector<2x2x128xf32> to vector<2x1x128xf32>
    %67 = vector.shape_cast %66 : vector<2x1x128xf32> to vector<2x128xf32>
    %68 = vector.extract_strided_slice %65 {offsets = [0, 1, 0], sizes = [2, 1, 128], strides = [1, 1, 1]} : vector<2x2x128xf32> to vector<2x1x128xf32>
    %69 = vector.shape_cast %68 : vector<2x1x128xf32> to vector<2x128xf32>
    %70 = arith.maximumf %67, %69 : vector<2x128xf32>
    %71 = arith.subf %69, %67 : vector<2x128xf32>
    %72 = math.absf %71 : vector<2x128xf32>
    %cst_28 = arith.constant 0.000000e+00 : f32
    %73 = vector.broadcast %cst_28 : f32 to vector<2x128xf32>
    %74 = arith.subf %73, %72 : vector<2x128xf32>
    %75 = math.exp %74 : vector<2x128xf32>
    %cst_29 = arith.constant 1.000000e+00 : f32
    %76 = vector.broadcast %cst_29 : f32 to vector<2x128xf32>
    %77 = arith.addf %76, %75 : vector<2x128xf32>
    %78 = math.log %77 : vector<2x128xf32>
    %79 = arith.addf %70, %78 : vector<2x128xf32>
    %80 = arith.subf %79, %69 : vector<2x128xf32>
    %cst_30 = arith.constant 1.000000e+00 : f32
    %81 = vector.broadcast %cst_30 : f32 to vector<2x128xf32>
    %82 = arith.mulf %81, %80 : vector<2x128xf32>
    %83 = arith.subf %79, %67 : vector<2x128xf32>
    %cst_31 = arith.constant 3.300000e-01 : f32
    %84 = vector.broadcast %cst_31 : f32 to vector<2x128xf32>
    %85 = arith.mulf %84, %83 : vector<2x128xf32>
    %86 = arith.select %5, %82, %85 : vector<2x128xi1>, vector<2x128xf32>
    %cst_32 = arith.constant dense<true> : vector<2x128xi1>
    %87 = arith.xori %9, %cst_32 : vector<2x128xi1>
    %cst_33 = arith.constant 0.000000e+00 : f32
    %88 = vector.broadcast %cst_33 : f32 to vector<2x128xf32>
    %89 = arith.cmpf ogt, %86, %88 : vector<2x128xf32>
    %90 = arith.andi %87, %89 : vector<2x128xi1>
    %cst_34 = arith.constant 0.000000e+00 : f32
    %91 = vector.broadcast %cst_34 : f32 to vector<2x128xf32>
    %92 = arith.select %90, %86, %91 : vector<2x128xi1>, vector<2x128xf32>
    %93 = arith.cmpf ogt, %69, %67 : vector<2x128xf32>
    %94 = arith.xori %93, %5 : vector<2x128xi1>
    %cst_35 = arith.constant dense<true> : vector<2x128xi1>
    %95 = arith.xori %94, %cst_35 : vector<2x128xi1>
    %96 = arith.andi %95, %13 : vector<2x128xi1>
    %97 = arith.extui %96 : vector<2x128xi1> to vector<2x128xi32>
    %98 = arith.sitofp %97 : vector<2x128xi32> to vector<2x128xf32>
    %cst_36 = arith.constant dense<0.000000e+00> : vector<2xf32>
    %99 = vector.multi_reduction <add>, %92, %cst_36 [1] : vector<2x128xf32> to vector<2xf32>
    %100 = vector.shape_cast %99 : vector<2xf32> to vector<2x1xf32>
    %cst_37 = arith.constant dense<0.000000e+00> : vector<2xf32>
    %101 = vector.multi_reduction <add>, %98, %cst_37 [1] : vector<2x128xf32> to vector<2xf32>
    %102 = vector.shape_cast %101 : vector<2xf32> to vector<2x1xf32>
    %103 = arith.extui %13 : vector<2x128xi1> to vector<2x128xi32>
    %104 = arith.sitofp %103 : vector<2x128xi32> to vector<2x128xf32>
    %cst_38 = arith.constant dense<0.000000e+00> : vector<2xf32>
    %105 = vector.multi_reduction <add>, %104, %cst_38 [1] : vector<2x128xf32> to vector<2xf32>
    %106 = vector.shape_cast %105 : vector<2xf32> to vector<2x1xf32>
    %c0_39 = arith.constant 0 : index
    %c0_40 = arith.constant 0 : index
    %c0_41 = arith.constant 0 : index
    %107 = vector.load %arg7[%c0_39, %c0_40, %c0_41] : memref<1x2x1xf32, #tpu.memory_space<vmem>>, vector<1x2x1xf32>
    %108 = vector.shape_cast %107 : vector<1x2x1xf32> to vector<2x1xf32>
    %109 = vector.shape_cast %100 : vector<2x1xf32> to vector<1x2x1xf32>
    tpu.vector_store %arg7[%c0_39, %c0_40, %c0_41], %109 {strides = array<i32>} : memref<1x2x1xf32, #tpu.memory_space<vmem>>, vector<1x2x1xf32>,
    %c0_42 = arith.constant 0 : index
    %c0_43 = arith.constant 0 : index
    %c0_44 = arith.constant 0 : index
    %110 = vector.load %arg8[%c0_42, %c0_43, %c0_44] : memref<1x2x1xf32, #tpu.memory_space<vmem>>, vector<1x2x1xf32>
    %111 = vector.shape_cast %110 : vector<1x2x1xf32> to vector<2x1xf32>
    %112 = vector.shape_cast %102 : vector<2x1xf32> to vector<1x2x1xf32>
    tpu.vector_store %arg8[%c0_42, %c0_43, %c0_44], %112 {strides = array<i32>} : memref<1x2x1xf32, #tpu.memory_space<vmem>>, vector<1x2x1xf32>,
    %c0_45 = arith.constant 0 : index
    %c0_46 = arith.constant 0 : index
    %c0_47 = arith.constant 0 : index
    %113 = vector.load %arg9[%c0_45, %c0_46, %c0_47] : memref<1x2x1xf32, #tpu.memory_space<vmem>>, vector<1x2x1xf32>
    %114 = vector.shape_cast %113 : vector<1x2x1xf32> to vector<2x1xf32>
    %115 = vector.shape_cast %106 : vector<2x1xf32> to vector<1x2x1xf32>
    tpu.vector_store %arg9[%c0_45, %c0_46, %c0_47], %115 {strides = array<i32>} : memref<1x2x1xf32, #tpu.memory_space<vmem>>, vector<1x2x1xf32>,
    return
  }
  func.func @transform_0(%arg0: i32) -> (i32, i32, i32) {
    %c0_i32 = arith.constant 0 : i32
    %c0_i32_0 = arith.constant 0 : i32
    %c0_i32_1 = arith.constant 0 : i32
    return %c0_i32, %c0_i32_0, %arg0 : i32, i32, i32
  }
  func.func @transform_1(%arg0: i32) -> (i32, i32, i32) {
    %c0_i32 = arith.constant 0 : i32
    %c0_i32_0 = arith.constant 0 : i32
    %c0_i32_1 = arith.constant 0 : i32
    return %c0_i32, %c0_i32_0, %arg0 : i32, i32, i32
  }
  func.func @transform_2(%arg0: i32) -> (i32, i32) {
    %c0_i32 = arith.constant 0 : i32
    %c0_i32_0 = arith.constant 0 : i32
    return %c0_i32, %arg0 : i32, i32
  }
  func.func @transform_3(%arg0: i32) -> (i32, i32, i32) {
    %c0_i32 = arith.constant 0 : i32
    %c0_i32_0 = arith.constant 0 : i32
    %c0_i32_1 = arith.constant 0 : i32
    return %arg0, %c0_i32, %c0_i32_0 : i32, i32, i32
  }
  func.func @transform_4(%arg0: i32) -> (i32, i32, i32) {
    %c0_i32 = arith.constant 0 : i32
    %c0_i32_0 = arith.constant 0 : i32
    %c0_i32_1 = arith.constant 0 : i32
    return %arg0, %c0_i32, %c0_i32_0 : i32, i32, i32
  }
  func.func @transform_5(%arg0: i32) -> (i32, i32, i32) {
    %c0_i32 = arith.constant 0 : i32
    %c0_i32_0 = arith.constant 0 : i32
    %c0_i32_1 = arith.constant 0 : i32
    return %arg0, %c0_i32, %c0_i32_0 : i32, i32, i32
  }
  func.func @transform_6(%arg0: i32) -> (i32, i32, i32) {
    %c0_i32 = arith.constant 0 : i32
    %c0_i32_0 = arith.constant 0 : i32
    %c0_i32_1 = arith.constant 0 : i32
    return %arg0, %c0_i32, %c0_i32_0 : i32, i32, i32
  }
  func.func @transform_7(%arg0: i32) -> (i32, i32, i32) {
    %c0_i32 = arith.constant 0 : i32
    %c0_i32_0 = arith.constant 0 : i32
    %c0_i32_1 = arith.constant 0 : i32
    return %arg0, %c0_i32, %c0_i32_0 : i32, i32, i32
  }
  func.func @transform_8(%arg0: i32) -> (i32, i32, i32) {
    %c0_i32 = arith.constant 0 : i32
    %c0_i32_0 = arith.constant 0 : i32
    %c0_i32_1 = arith.constant 0 : i32
    return %arg0, %c0_i32, %c0_i32_0 : i32, i32, i32
  }
}

</mosaic_0001>

<bundles_post_ra>
// kernel: edge_criterion_forward.2
= control target key start
LH: loop header
LB: loop body
LE: loop exit
PB: predicated region body
PF: predicated region fallthrough
CT: control target
= control target key end

     0   :  { %v158_v13 = vmov 0   ;;  %vm109_vm2 = vcmask 1041408   ;;  %v159_v21 = vmov 0.0   ;;  %vm69_vm8 = vcmask 1041409   ;;  %s251_s0 = inlined_call_operand.vmem [shape: f32[2,2,128], index: 0, kind: input, shape index: {}]   ;;  %s252_s1 = inlined_call_operand.vmem [shape: s8[2,128], index: 1, kind: input, shape index: {}]   ;;  %s253_s4 = inlined_call_operand.vmem [shape: f32[1,2,1], index: 4, kind: output, shape index: {2}]   ;;  %s254_s2 = inlined_call_operand.vmem [shape: f32[1,2,1], index: 2, kind: output, shape index: {0}]   ;;  %s255_s3 = inlined_call_operand.vmem [shape: f32[1,2,1], index: 3, kind: output, shape index: {1}]  }
   0x1   :  { %v14_v0 = vld [vmem:[%s252_s1] sm:$0x1]  ;;  %v197_v2 = vld [vmem:[%s251_s0 + $0x2] sm:$0x3]  ;;  %vm71_vm9 = vcmask 1045509   ;;  %vm160_vm11 = vmmov 1  }
   0x2   :  { %v192_v1 = vld [vmem:[%s251_s0] sm:$0x3]  ;;  %v199_v3 = vunpack.c.0.s8 %v14_v0  ;;  %v33_v5 = vrot.slane %v197_v2, 7  ;;  %v27_v29 = vrot.slane %v197_v2, 1 }
   0x3   :  { %v32_v4 = vrot.slane %v192_v1, 7  ;;  %v26_v28 = vrot.slane %v192_v1, 1 }
   0x4   :  { %v16_v6 = vand.u32 1, %v199_v3  ;;  %v37_v8 = vsub.f32 %v197_v2, %v33_v5  ;;  %v20_v10 = vand.u32 4, %v199_v3  ;;  %v31_v34 = vmax.f32 %v197_v2, %v27_v29 }
   0x5   :  { %v36_v7 = vsub.f32 %v192_v1, %v32_v4  ;;  %v30_v32 = vmax.f32 %v192_v1, %v26_v28  ;;  %vm86_vm3 = vcmp.gt.f32.partialorder %v197_v2, %v33_v5  ;;  %v18_v42 = vand.u32 2, %v199_v3 }
   0x6   :  { %vm206_vm0 = vcmp.eq.s32.totalorder %v16_v6, 1  ;;  %v39_v12 = vand.u32 2147483647, %v37_v8  ;;  %vm21_vm1 = vcmp.ne.s32.totalorder %v20_v10, 0  ;;  %vm222_vm6 = vcmp.gt.f32.partialorder %v192_v1, %v32_v4 }
   0x7   :  { %v38_v11 = vand.u32 2147483647, %v36_v7  ;;  %v87_v14 = vsel %vm206_vm0, 1, %v158_v13  ;;  %v97_v19 = vsel %vm21_vm1, 1, %v158_v13  ;;  %v146_v22 = vsel %vm21_vm1, 1.0, %v159_v21 }
   0x8   :  { %88 = vst [vmem:[#allocation1] ss:$2 sm:$0xff] %v87_v14  ;;  %v41_v16 = vsub.f32 0.0, %v39_v12  ;;  %v124_v24 = vsel %vm109_vm2, %v146_v22, 0.0  ;;  %vm19_vm14 = vcmp.ne.s32.totalorder %v18_v42, 0 }
   0x9   :  { %v40_v15 = vsub.f32 0.0, %v38_v11  ;;  %125 = vadd.xlane.f32.xlu1 %v124_v24 }
   0xa   :  { %v44_v18 = vmul.f32 1.442695, %v41_v16 }
   0xb   :  { %v42_v17 = vmul.f32 1.442695, %v40_v15 }
   0xd   :  { %150 = vpow2.f32 %v42_v17 }
   0xe   :  { %152 = vpow2.f32 %v44_v18 }
   0xf   :  { %v89_v20 = vld.sshfl [vmem:[#allocation1] sm:$0xff pattern:$0x75316420] }
  0x10   :  { %98 = vst [vmem:[#allocation1] ss:$2 sm:$0xff] %v97_v19  ;;  %vm92_vm4 = vcmp.ne.s32.totalorder %v89_v20, 0  ;;  %v90_v38 = vrot.slane %v89_v20, 7 }
  0x11   :  { %vm94_vm5 = vmxor %vm86_vm3, %vm92_vm4 }
  0x12   :  { %vm227_vm7 = vcmp.ne.s32.totalorder %v90_v38, 0  ;;  %vm96_vm12 = vmxor %vm94_vm5, %vm160_vm11 }
  0x13   :  { %v151_v23 = vpop.eup %150  ;;  %vm93_vm13 = vmxor %vm222_vm6, %vm227_vm7 }
  0x14   :  { %v153_v25 = vpop.eup %152  ;;  %v46_v26 = vadd.f32 1.0, %v151_v23  ;;  %vm95_vm1 = vmxor %vm93_vm13, %vm160_vm11 }
  0x15   :  { %v47_v27 = vadd.f32 1.0, %v153_v25  ;;  %vm81_vm4 = vmxor %vm19_vm14, %vm160_vm11 }
  0x16   :  { %154 = vlog2.f32 %v46_v26 }
  0x17   :  { %156 = vlog2.f32 %v47_v27  ;;  %v99_v41 = vld.sshfl [vmem:[#allocation1] sm:$0xff pattern:$0x75316420] }
  0x18   :  { %vm102_vm10 = vcmp.ne.s32.totalorder %v99_v41, 0  ;;  %v100_v52 = vrot.slane %v99_v41, 7 }
  0x19   :  { %vm104_vm15 = vmand %vm96_vm12, %vm102_vm10  ;;  %vm116_vm10 = vcmask 1042434  }
  0x1a   :  { %vm101_vm3 = vcmp.ne.s32.totalorder %v100_v52, 0  ;;  %v145_v59 = vsel %vm104_vm15, 1.0, %v159_v21 }
  0x1b   :  { %vm103_vm6 = vmand %vm95_vm1, %vm101_vm3  ;;  %v115_v61 = vrot.slane %v145_v59, 7 }
  0x1c   :  { %v155_v30 = vpop.eup %154  ;;  %v144_v63 = vsel %vm103_vm6, 1.0, %v159_v21 }
  0x1d   :  { %v157_v31 = vpop.eup %156  ;;  %v49_v33 = vmul.f32 0.6931472, %v155_v30  ;;  %v117_v0 = vsel %vm116_vm10, %v115_v61, %v144_v63 }
  0x1e   :  { %v51_v35 = vmul.f32 0.6931472, %v157_v31 }
  0x1f   :  { %v54_v36 = vrot.slane %v49_v33, 1 }
  0x20   :  { %v55_v37 = vrot.slane %v51_v35, 1 }
  0x21   :  { %v58_v39 = vadd.f32 %v54_v36, %v30_v32 }
  0x22   :  { %v59_v40 = vadd.f32 %v55_v37, %v31_v34 }
  0x23   :  { %v62_v43 = vsub.f32 %v58_v39, %v192_v1  ;;  %v60_v45 = vsub.f32 %v58_v39, %v26_v28 }
  0x24   :  { %v61_v46 = vsub.f32 %v59_v40, %v27_v29  ;;  %v63_v47 = vsub.f32 %v59_v40, %v197_v2 }
  0x25   :  { %v64_v49 = vmul.f32 0.33, %v62_v43 }
  0x26   :  { %v65_v50 = vmul.f32 0.33, %v63_v47  ;;  %v68_v51 = vrot.slane %v61_v46, 7 }
  0x28   :  { %v70_v53 = vsel %vm69_vm8, %v68_v51, %v60_v45  ;;  %v76_v54 = vrot.slane %v65_v50, 7 }
  0x29   :  { %v72_v55 = vsel %vm71_vm9, %v68_v51, %v70_v53 }
  0x2a   :  { %v77_v56 = vsel %vm69_vm8, %v76_v54, %v64_v49  ;;  %vm119_vm8 = vcmask 1042433  }
  0x2b   :  { %v78_v57 = vsel %vm71_vm9, %v76_v54, %v77_v56  ;;  %v120_v1 = vsel %vm119_vm8, %v117_v0, 0.0  ;;  %vm127_vm9 = vcmask 1024  }
  0x2c   :  { %v80_v58 = vsel %vm206_vm0, %v72_v55, %v78_v57  ;;  %vm129_vm0 = vcmask 2049  }
  0x2d   :  { %vm82_vm5 = vcmp.gt.f32.partialorder %v80_v58, 0.0 }
  0x2e   :  { %vm83_vm7 = vmand %vm81_vm4, %vm82_vm5 }
  0x2f   :  { %v84_v60 = vsel %vm83_vm7, %v80_v58, 0.0 }
  0x30   :  { %v110_v62 = vsel %vm109_vm2, %v84_v60, 0.0 }
  0x31   :  { %111 = vadd.xlane.f32.xlu0 %v110_v62 }
  0x39   :  { %121 = vadd.xlane.f32.xlu0 %v120_v1 }
  0x7c   :  { %v126_v2 = vpop.xlane.xlu1 %125 }
  0x7d   :  { %131 = vst.msk [vmem:[%s253_s4] sm:$0x3] %vm127_vm9, %v126_v2 }
  0xa4   :  { %v112_v3 = vpop.xlane.xlu0 %111 }
  0xa5   :  { %128 = vst.msk [vmem:[%s254_s2] sm:$0x3] %vm127_vm9, %v112_v3 }
  0xac   :  { %v122_v4 = vpop.xlane.xlu0 %121 }
  0xad   :  { %130 = vst.msk [vmem:[%s255_s3 - $0x1] sm:$0x6] %vm129_vm0, %v122_v4 }

// kernel: edge_criterion_forward.3
= control target key start
LH: loop header
LB: loop body
LE: loop exit
PB: predicated region body
PF: predicated region fallthrough
CT: control target
= control target key end

     0   :  { %vm567_vm0 = vcmask 1041408   ;;  %v282_v16 = vmov 0.0   ;;  %v283_v21 = vmov 0   ;;  %vm75_vm5 = vcmask 1041409   ;;  %s558_s2 = inlined_call_operand.vmem [shape: s8[2,128], index: 2, kind: input, shape index: {}]   ;;  %s559_s0 = inlined_call_operand.vmem [shape: f32[2,2,128], index: 0, kind: input, shape index: {}]   ;;  %s560_s1 = inlined_call_operand.vmem [shape: f32[2,2,128], index: 1, kind: input, shape index: {}]   ;;  %s561_s5 = inlined_call_operand.vmem [shape: f32[1,2,1], index: 5, kind: output, shape index: {2}]   ;;  %s562_s8 = inlined_call_operand.vmem [shape: f32[1,2,1], index: 8, kind: output, shape index: {5}]   ;;  %s563_s7 = inlined_call_operand.vmem [shape: f32[1,2,1], index: 7, kind: output, shape index: {4}]   ;;  %s564_s3 = inlined_call_operand.vmem [shape: f32[1,2,1], index: 3, kind: output, shape index: {0}]   ;;  %s565_s6 = inlined_call_operand.vmem [shape: f32[1,2,1], index: 6, kind: output, shape index: {3}]   ;;  %s566_s4 = inlined_call_operand.vmem [shape: f32[1,2,1], index: 4, kind: output, shape index: {1}]  }
   0x1   :  { %v20_v0 = vld [vmem:[%s558_s2] sm:$0x1]  ;;  %v341_v2 = vld [vmem:[%s559_s0 + $0x2] sm:$0x3]  ;;  %vm77_vm11 = vcmask 1045509   ;;  %vm284_vm15 = vmmov 1  }
   0x2   :  { %v336_v1 = vld [vmem:[%s559_s0] sm:$0x3]  ;;  %v343_v3 = vunpack.c.0.s8 %v20_v0  ;;  %v39_v6 = vrot.slane %v341_v2, 7  ;;  %v355_v7 = vld [vmem:[%s560_s1 + $0x2] sm:$0x3]  ;;  %v33_v47 = vrot.slane %v341_v2, 1 }
   0x3   :  { %v38_v4 = vrot.slane %v336_v1, 7  ;;  %v349_v5 = vld [vmem:[%s560_s1] sm:$0x3]  ;;  %v149_v13 = vrot.slane %v355_v7, 7  ;;  %v32_v46 = vrot.slane %v336_v1, 1  ;;  %v143_v51 = vrot.slane %v355_v7, 1 }
   0x4   :  { %v26_v8 = vand.u32 4, %v343_v3  ;;  %v22_v9 = vand.u32 1, %v343_v3  ;;  %v43_v11 = vsub.f32 %v341_v2, %v39_v6  ;;  %v148_v12 = vrot.slane %v349_v5, 7 }
   0x5   :  { %v42_v10 = vsub.f32 %v336_v1, %v38_v4  ;;  %v153_v23 = vsub.f32 %v355_v7, %v149_v13  ;;  %v142_v48 = vrot.slane %v349_v5, 1  ;;  %v36_v53 = vmax.f32 %v336_v1, %v32_v46 }
   0x6   :  { %vm365_vm1 = vcmp.ne.s32.totalorder %v26_v8, 0  ;;  %vm369_vm2 = vcmp.eq.s32.totalorder %v22_v9, 1  ;;  %v45_v19 = vand.u32 2147483647, %v43_v11  ;;  %v152_v26 = vsub.f32 %v349_v5, %v148_v12 }
   0x7   :  { %v260_v17 = vsel %vm365_vm1, 1.0, %v282_v16  ;;  %v44_v18 = vand.u32 2147483647, %v42_v10  ;;  %v93_v22 = vsel %vm369_vm2, 1, %v283_v21  ;;  %v155_v27 = vand.u32 2147483647, %v153_v23 }
   0x8   :  { %v130_v20 = vsel %vm567_vm0, %v260_v17, 0.0  ;;  %v47_v25 = vsub.f32 0.0, %v45_v19  ;;  %94 = vst [vmem:[#allocation1] ss:$2 sm:$0xff] %v93_v22  ;;  %v154_v30 = vand.u32 2147483647, %v152_v26  ;;  %vm395_vm3 = vcmp.gt.f32.partialorder %v341_v2, %v39_v6 }
   0x9   :  { %131 = vadd.xlane.f32.xlu1 %v130_v20  ;;  %v46_v24 = vsub.f32 0.0, %v44_v18  ;;  %v157_v31 = vsub.f32 0.0, %v155_v27  ;;  %v103_v33 = vsel %vm365_vm1, 1, %v283_v21  ;;  %v24_v56 = vand.u32 2, %v343_v3 }
   0xa   :  { %v50_v29 = vmul.f32 1.442695, %v47_v25  ;;  %v156_v32 = vsub.f32 0.0, %v154_v30  ;;  %v37_v57 = vmax.f32 %v341_v2, %v33_v47  ;;  %v146_v61 = vmax.f32 %v349_v5, %v142_v48 }
   0xb   :  { %v48_v28 = vmul.f32 1.442695, %v46_v24  ;;  %v160_v34 = vmul.f32 1.442695, %v157_v31  ;;  %vm407_vm6 = vcmp.gt.f32.partialorder %v336_v1, %v38_v4  ;;  %vm418_vm8 = vcmp.gt.f32.partialorder %v355_v7, %v149_v13 }
   0xc   :  { %v158_v35 = vmul.f32 1.442695, %v156_v32  ;;  %v147_v9 = vmax.f32 %v355_v7, %v143_v51  ;;  %vm438_vm13 = vcmp.gt.f32.partialorder %v349_v5, %v148_v12 }
   0xd   :  { %266 = vpow2.f32 %v48_v28 }
   0xe   :  { %268 = vpow2.f32 %v50_v29 }
   0xf   :  { %v95_v36 = vld.sshfl [vmem:[#allocation1] sm:$0xff pattern:$0x75316420]  ;;  %270 = vpow2.f32 %v160_v34 }
  0x10   :  { %104 = vst [vmem:[#allocation1] ss:$2 sm:$0xff] %v103_v33  ;;  %272 = vpow2.f32 %v158_v35  ;;  %v96_v49 = vrot.slane %v95_v36, 7  ;;  %vm98_vm4 = vcmp.ne.s32.totalorder %v95_v36, 0 }
  0x11   :  { %vm426_vm9 = vmxor %vm395_vm3, %vm98_vm4 }
  0x12   :  { %vm411_vm7 = vcmp.ne.s32.totalorder %v96_v49, 0  ;;  %vm449_vm1 = vmxor %vm426_vm9, %vm284_vm15 }
  0x13   :  { %v267_v37 = vpop.eup %266  ;;  %vm99_vm12 = vmxor %vm407_vm6, %vm411_vm7 }
  0x14   :  { %v269_v38 = vpop.eup %268  ;;  %v52_v39 = vadd.f32 1.0, %v267_v37  ;;  %vm462_vm4 = vmxor %vm99_vm12, %vm284_vm15 }
  0x15   :  { %v53_v40 = vadd.f32 1.0, %v269_v38  ;;  %v271_v41 = vpop.eup %270 }
  0x16   :  { %274 = vlog2.f32 %v52_v39  ;;  %v273_v42 = vpop.eup %272  ;;  %v163_v43 = vadd.f32 1.0, %v271_v41 }
  0x17   :  { %276 = vlog2.f32 %v53_v40  ;;  %v387_v44 = vld.sshfl [vmem:[#allocation1] sm:$0xff pattern:$0x75316420]  ;;  %v162_v45 = vadd.f32 1.0, %v273_v42 }
  0x18   :  { %200 = vst [vmem:[#allocation1] ss:$2 sm:$0xff] %v93_v22  ;;  %278 = vlog2.f32 %v163_v43  ;;  %v106_v30 = vrot.slane %v387_v44, 7  ;;  %vm108_vm6 = vcmp.ne.s32.totalorder %v387_v44, 0 }
  0x19   :  { %280 = vlog2.f32 %v162_v45  ;;  %vm110_vm0 = vmand %vm449_vm1, %vm108_vm6 }
  0x1a   :  { %vm500_vm1 = vcmp.ne.s32.totalorder %v106_v30, 0 }
  0x1c   :  { %v275_v50 = vpop.eup %274 }
  0x1d   :  { %v277_v52 = vpop.eup %276  ;;  %v55_v54 = vmul.f32 0.6931472, %v275_v50  ;;  %v259_v50 = vsel %vm110_vm0, 1.0, %v282_v16  ;;  %vm109_vm0 = vmand %vm462_vm4, %vm500_vm1  ;;  %vm135_vm1 = vcmask 2049  }
  0x1e   :  { %v57_v58 = vmul.f32 0.6931472, %v277_v52  ;;  %v279_v59 = vpop.eup %278  ;;  %v121_v62 = vrot.slane %v259_v50, 7 }
  0x1f   :  { %v60_v60 = vrot.slane %v55_v54, 1  ;;  %v281_v0 = vpop.eup %280  ;;  %v201_v6 = vld.sshfl [vmem:[#allocation1] sm:$0xff pattern:$0x75316420]  ;;  %v167_v4 = vmul.f32 0.6931472, %v279_v59 }
  0x20   :  { %v61_v3 = vrot.slane %v57_v58, 1  ;;  %209 = vst [vmem:[#allocation1] ss:$2 sm:$0xff] %v103_v33  ;;  %v202_v14 = vrot.slane %v201_v6, 7  ;;  %vm204_vm10 = vcmp.ne.s32.totalorder %v201_v6, 0 }
  0x21   :  { %v64_v11 = vadd.f32 %v60_v60, %v36_v53  ;;  %v165_v17 = vmul.f32 0.6931472, %v281_v0  ;;  %v171_v13 = vrot.slane %v167_v4, 1  ;;  %vm457_vm3 = vmxor %vm418_vm8, %vm204_vm10  ;;  %vm473_vm8 = vcmp.ne.s32.totalorder %v24_v56, 0 }
  0x22   :  { %v65_v18 = vadd.f32 %v61_v3, %v37_v57  ;;  %vm442_vm14 = vcmp.ne.s32.totalorder %v202_v14, 0  ;;  %vm208_vm12 = vmxor %vm457_vm3, %vm284_vm15  ;;  %v258_v0 = vsel %vm109_vm0, 1.0, %v282_v16 }
  0x23   :  { %v68_v19 = vsub.f32 %v64_v11, %v336_v1  ;;  %v170_v22 = vrot.slane %v165_v17, 1  ;;  %v66_v1 = vsub.f32 %v64_v11, %v32_v46  ;;  %v175_v26 = vadd.f32 %v171_v13, %v147_v9  ;;  %vm205_vm7 = vmxor %vm438_vm13, %vm442_vm14 }
  0x24   :  { %v67_v24 = vsub.f32 %v65_v18, %v33_v47  ;;  %v69_v12 = vsub.f32 %v65_v18, %v341_v2  ;;  %vm495_vm3 = vmxor %vm205_vm7, %vm284_vm15 }
  0x25   :  { %v70_v27 = vmul.f32 0.33, %v68_v19  ;;  %v174_v28 = vadd.f32 %v170_v22, %v146_v61  ;;  %v177_v32 = vsub.f32 %v175_v26, %v143_v51  ;;  %v179_v33 = vsub.f32 %v175_v26, %v355_v7  ;;  %vm508_vm13 = vmxor %vm473_vm8, %vm284_vm15 }
  0x26   :  { %v71_v2 = vmul.f32 0.33, %v69_v12  ;;  %v74_v31 = vrot.slane %v67_v24, 7  ;;  %vm600_vm8 = vcmask 1042434  }
  0x27   :  { %v178_v35 = vsub.f32 %v174_v28, %v349_v5  ;;  %v210_v38 = vld.sshfl [vmem:[#allocation1] sm:$0xff pattern:$0x75316420]  ;;  %v176_v39 = vsub.f32 %v174_v28, %v142_v48  ;;  %v181_v7 = vmul.f32 0.33, %v179_v33  ;;  %v184_v44 = vrot.slane %v177_v32, 7 }
  0x28   :  { %v76_v36 = vsel %vm75_vm5, %v74_v31, %v66_v1  ;;  %v82_v37 = vrot.slane %v71_v2, 7  ;;  %v211_v5 = vrot.slane %v210_v38, 7  ;;  %vm213_vm10 = vcmp.ne.s32.totalorder %v210_v38, 0 }
  0x29   :  { %v78_v40 = vsel %vm77_vm11, %v74_v31, %v76_v36  ;;  %v180_v42 = vmul.f32 0.33, %v178_v35  ;;  %vm215_vm9 = vmand %vm208_vm12, %vm213_vm10  ;;  %v190_v45 = vrot.slane %v181_v7, 7  ;;  %v185_v53 = vsel %vm75_vm5, %v184_v44, %v176_v39 }
  0x2a   :  { %v83_v43 = vsel %vm75_vm5, %v82_v37, %v70_v27  ;;  %vm212_vm14 = vcmp.ne.s32.totalorder %v211_v5, 0  ;;  %v262_v49 = vsel %vm215_vm9, 1.0, %v282_v16  ;;  %v186_v56 = vsel %vm77_vm11, %v184_v44, %v185_v53  ;;  %vm604_vm12 = vmmov %vm600_vm8 }
  0x2b   :  { %v84_v47 = vsel %vm77_vm11, %v82_v37, %v83_v43  ;;  %vm214_vm6 = vmand %vm495_vm3, %vm212_vm14  ;;  %v225_v52 = vrot.slane %v262_v49, 7  ;;  %v191_v54 = vsel %vm75_vm5, %v190_v45, %v180_v42  ;;  %vm601_vm5 = vcmask 1042433  }
  0x2c   :  { %v86_v51 = vsel %vm369_vm2, %v78_v40, %v84_v47  ;;  %v261_v55 = vsel %vm214_vm6, 1.0, %v282_v16  ;;  %v192_v57 = vsel %vm77_vm11, %v190_v45, %v191_v54  ;;  %vm602_vm10 = vcmask 1041408  }
  0x2d   :  { %vm88_vm15 = vcmp.gt.f32.partialorder %v86_v51, 0.0  ;;  %v226_v58 = vsel %vm600_vm8, %v225_v52, %v261_v55  ;;  %v194_v59 = vsel %vm369_vm2, %v186_v56, %v192_v57  ;;  %vm603_vm4 = vmmov %vm602_vm10  ;;  %v123_v15 = vsel %vm604_vm12, %v121_v62, %v258_v0 }
  0x2e   :  { %vm89_vm7 = vmand %vm508_vm13, %vm88_vm15  ;;  %v228_v61 = vsel %vm601_vm5, %v226_v58, 0.0  ;;  %vm195_vm9 = vcmp.gt.f32.partialorder %v194_v59, 0.0  ;;  %vm133_vm3 = vcmask 1024  }
  0x2f   :  { %v90_v60 = vsel %vm89_vm7, %v86_v51, 0.0  ;;  %229 = vadd.xlane.f32.xlu2 %v228_v61  ;;  %vm196_vm11 = vmand %vm508_vm13, %vm195_vm9 }
  0x30   :  { %v116_v63 = vsel %vm602_vm10, %v90_v60, 0.0  ;;  %v197_v3 = vsel %vm196_vm11, %v194_v59, 0.0  ;;  %vm605_vm2 = vmmov %vm601_vm5 }
  0x31   :  { %117 = vadd.xlane.f32.xlu0 %v116_v63  ;;  %v220_v6 = vsel %vm603_vm4, %v197_v3, 0.0  ;;  %v126_v8 = vsel %vm605_vm2, %v123_v15, 0.0 }
  0x32   :  { %221 = vadd.xlane.f32.xlu1 %v220_v6 }
  0x39   :  { %127 = vadd.xlane.f32.xlu0 %v126_v8 }
  0x7c   :  { %v132_v9 = vpop.xlane.xlu1 %131 }
  0x7d   :  { %137 = vst.msk [vmem:[%s561_s5] sm:$0x3] %vm133_vm3, %v132_v9 }
  0x7e   :  { %233 = vst.msk [vmem:[%s562_s8] sm:$0x3] %vm133_vm3, %v132_v9 }
  0xa2   :  { %v230_v16 = vpop.xlane.xlu2 %229 }
  0xa3   :  { %232 = vst.msk [vmem:[%s563_s7 - $0x1] sm:$0x6] %vm135_vm1, %v230_v16 }
  0xa4   :  { %v118_v4 = vpop.xlane.xlu0 %117 }
  0xa5   :  { %134 = vst.msk [vmem:[%s564_s3] sm:$0x3] %vm133_vm3, %v118_v4  ;;  %v222_v10 = vpop.xlane.xlu1 %221 }
  0xa6   :  { %231 = vst.msk [vmem:[%s565_s6] sm:$0x3] %vm133_vm3, %v222_v10 }
  0xac   :  { %v128_v11 = vpop.xlane.xlu0 %127 }
  0xad   :  { %136 = vst.msk [vmem:[%s566_s4 - $0x1] sm:$0x6] %vm135_vm1, %v128_v11 }

</bundles_post_ra>
